<compile_context>
chip_gen: v7x
topology: tpu7x:2x2x1
jax: 0.10.0
libtpu: 0.0.40
codegen_flags: <defaults>
</compile_context>

<pallas_src>
import jax
import jax.numpy as jnp
from jax.experimental import pallas as pl
from jax.experimental.pallas import tpu as pltpu

_LANES = 128
_MIN_SPLIT_ROWS = 1024        # each half >= ~512 rows stays near HBM roofline
_VMEM_LIMIT_BYTES = 32 * 1024 * 1024


def _copy_kernel(x_ref, o_ref):
    # forward(): return self.X  ->  identity copy of the current tile.
    o_ref[...] = x_ref[...]


def _sublane_multiple(dtype):
    # Sublane packing: 8 rows for 4-byte dtypes, 16 for 2-byte, 32 for 1-byte.
    itemsize = jnp.dtype(dtype).itemsize
    return max(8, 32 // itemsize)


def point_latent_variable_forward(X, *, use_kernel=False,
                                  vmem_budget_bytes=16 * 1024 * 1024,
                                  max_tile_rows=2048):
    """Pallas implementation of PointLatentVariable.forward().

    X: jnp.ndarray of shape (n, latent_dim).

    use_kernel=False (default): returns X itself — zero HBM traffic, zero
    dispatch overhead (the semantically exact, optimal implementation).

    use_kernel=True: materializes the output via a lane-dense tiled Pallas
    copy (kept for when an explicit kernel boundary is required).
    """
    n, latent_dim = X.shape

    if not use_kernel:
        # forward() is a pure identity; the best "kernel" is no copy at all.
        return X

    dtype = X.dtype
    itemsize = jnp.dtype(dtype).itemsize
    sub = _sublane_multiple(dtype)
    total = n * latent_dim

    # --- lane-dense layout --------------------------------------------------
    # Pad the flattened parameter up to a multiple of sub*128 (at most ~4 KiB
    # of padding) and present it as (rows, 128): full-lane unmasked stores,
    # contiguous DMA, and rows always sublane-aligned.  Padding cost is
    # O(one tile) and hidden by the pipeline.
    chunk = sub * _LANES
    padded_total = ((total + chunk - 1) // chunk) * chunk
    flat = X.reshape(total)
    if padded_total != total:
        flat = jnp.pad(flat, (0, padded_total - total))
    rows = padded_total // _LANES
    x2d = flat.reshape(rows, _LANES)

    # --- tile_r selection -----------------------------------------------------
    row_bytes = _LANES * itemsize
    # 2 input + 2 output double buffers live per grid step; clamp the 4-buffer
    # working set against both the soft budget and the hard compiler limit.
    budget = min(vmem_budget_bytes, _VMEM_LIMIT_BYTES // 2)
    tile_r = max(sub, ((budget // 4) // row_bytes) // sub * sub)
    tile_r = min(tile_r, max(sub, (max_tile_rows // sub) * sub))
    tile_r = min(tile_r, rows)

    # For large arrays, cap at ceil(rows/2) (rounded up to a sublane multiple)
    # so the grid has >= 2 steps — and exactly 2 when it fits the budget — and
    # the "parallel" axis can shard the copy across both v7x TensorCores.
    if rows >= _MIN_SPLIT_ROWS:
        half_up = ((pl.cdiv(rows, 2) + sub - 1) // sub) * sub
        tile_r = min(tile_r, half_up)

    grid = (pl.cdiv(rows, tile_r),)   # ragged last block is masked by Pallas

    out2d = pl.pallas_call(
        _copy_kernel,
        out_shape=jax.ShapeDtypeStruct((rows, _LANES), dtype),
        grid=grid,
        in_specs=[pl.BlockSpec((tile_r, _LANES), lambda i: (i, 0))],
        out_specs=pl.BlockSpec((tile_r, _LANES), lambda i: (i, 0)),
        compiler_params=pltpu.CompilerParams(
            # "parallel" lets multi-TensorCore chips (v7x) shard the row axis.
            dimension_semantics=("parallel",),
            vmem_limit_bytes=_VMEM_LIMIT_BYTES,
        ),
    )(x2d)

    out_flat = out2d.reshape(padded_total)
    if padded_total != total:
        out_flat = out_flat[:total]
    return out_flat.reshape(n, latent_dim)


class PointLatentVariable:
    """JAX mirror of the PyTorch module: holds parameter X, forward returns it."""

    def __init__(self, n, latent_dim, X_init):
        assert X_init.shape == (n, latent_dim)
        self.n = n
        self.latent_dim = latent_dim
        self.X = X_init  # registered "parameter"

    def forward(self, use_kernel=False):
        return point_latent_variable_forward(self.X, use_kernel=use_kernel)


if __name__ == "__main__":
    # Deterministic parameter init (synthetic, no checkpoint load).
    n, latent_dim = 16, 32
    key = jax.random.PRNGKey(0)
    X_init = jax.random.normal(key, (n, latent_dim), dtype=jnp.float32)

    module = PointLatentVariable(n, latent_dim, X_init)

    # Default (optimal) path: forward() hands back the parameter, zero copy.
    out_fast = module.forward()
    assert out_fast is module.X

    # Pallas kernel path (lane-dense padded copy), exercised once.
    out = module.forward(use_kernel=True)
    out = jax.block_until_ready(out)

    # Semantics check: forward() must return exactly X.
    assert out.shape == (n, latent_dim)
    assert out.dtype == X_init.dtype
    assert bool(jnp.all(out == X_init))

    # Ragged shape: exercises the padding + cdiv partial-block path.
    n2, d2 = 17, 5
    X2 = jax.random.normal(jax.random.PRNGKey(1), (n2, d2), dtype=jnp.float32)
    out2 = jax.block_until_ready(
        point_latent_variable_forward(X2, use_kernel=True))
    assert out2.shape == (n2, d2)
    assert bool(jnp.all(out2 == X2))

    print("KERNEL_OK")
</pallas_src>

<mosaic_0001>
module attributes {stable_mosaic.version = 11 : i64} {
  func.func @_copy_kernel(%arg0: i32, %arg1: memref<8x128xf32, #tpu.memory_space<vmem>>, %arg2: memref<8x128xf32, #tpu.memory_space<vmem>>) attributes {dimension_semantics = [#tpu.dimension_semantics<parallel>], iteration_bounds = array<i64: 1>, scalar_prefetch = 0 : i64, scratch_operands = 0 : i64, tpu.core_type = #tpu.core_type<tc>, window_params = [{transform_indices = @transform_0, window_bounds = array<i64: 8, 128>}, {transform_indices = @transform_1, window_bounds = array<i64: 8, 128>}]} {
    %c0 = arith.constant 0 : index
    %c0_0 = arith.constant 0 : index
    %0 = vector.load %arg1[%c0, %c0_0] : memref<8x128xf32, #tpu.memory_space<vmem>>, vector<8x128xf32>
    %c0_1 = arith.constant 0 : index
    %c0_2 = arith.constant 0 : index
    %1 = vector.load %arg2[%c0_1, %c0_2] : memref<8x128xf32, #tpu.memory_space<vmem>>, vector<8x128xf32>
    tpu.vector_store %arg2[%c0_1, %c0_2], %0 {strides = array<i32>} : memref<8x128xf32, #tpu.memory_space<vmem>>, vector<8x128xf32>,
    return
  }
  func.func @transform_0(%arg0: i32) -> (i32, i32) {
    %c0_i32 = arith.constant 0 : i32
    %c0_i32_0 = arith.constant 0 : i32
    return %arg0, %c0_i32 : i32, i32
  }
  func.func @transform_1(%arg0: i32) -> (i32, i32) {
    %c0_i32 = arith.constant 0 : i32
    %c0_i32_0 = arith.constant 0 : i32
    return %arg0, %c0_i32 : i32, i32
  }
}

</mosaic_0001>

<bundles_post_ra>
// kernel: tpu_custom_call.1
= control target key start
LH: loop header
LB: loop body
LE: loop exit
PB: predicated region body
PF: predicated region fallthrough
CT: control target
= control target key end

     0   :  { %6 = vsyncpa [#allocation3], 0  ;;  %s124_s0 = inlined_call_operand.hbm [shape: f32[8,128], index: 0, kind: input, shape index: {}]   ;;  %s125_s1 = inlined_call_operand.hbm [shape: f32[8,128], index: 1, kind: output, shape index: {}]  }
   0x1   :  { %7 = vsyncpa [#allocation4], 0  ;;  %s88_s6 = smov [#allocation2]   ;;  %s40_s10 = scalar_lea.hbm %s124_s0, 128 }
   0x2   :  { %s14_s7 = sshll.u32 %s88_s6, 4  ;;  %p41_p0 = scmp.ne.s32.totalorder %s124_s0, %s40_s10  ;;  %s15_s7 = int_to_ptr.vmem [resolvable:$true] %s14_s7 }
   0x3   :  { %p44_p1 = scmp.lt.u32.totalorder %s40_s10, %s124_s0 }
   0x5   :  { %p46_p2 = pnand %p44_p1, %p41_p0 }
   0x7   :  { %49 = shalt.err (!%p46_p2)
}
   0x8   :  { %s50_s15 = scalar_lea.vmem %s15_s7, 128  ;;  %p55_p4 = scmp.lt.s32.totalorder %s15_s7, %s15_s7 }
   0x9   :  { %p51_p3 = scmp.ne.s32.totalorder %s15_s7, %s50_s15  ;;  %p56_p5 = scmp.lt.s32.totalorder %s50_s15, %s50_s15 }
   0xb   :  { %p57_p6 = por %p56_p5, %p55_p4 }
   0xd   :  { %p58_p7 = pnand %p57_p6, %p51_p3 }
   0xf   :  { %61 = shalt.err (!%p58_p7)
}
  0x10   :  { %17 = dma.hbm_to_vmem [thread:$0]  %s124_s0, 128, %s15_s7, [#allocation3]  }
  0x11   :  { %84 = dma.done.wait [#allocation3], 128  }
  0x12   :  { %85 = vsyncadd [#allocation3], 4294967168  ;;  %s89_s18 = smov [#allocation5]   ;;  %v21_v0 = vld [vmem:[#allocation2] sm:$0xff] }
  0x13   :  { %s29_s19 = sshll.u32 %s89_s18, 4  ;;  %22 = vst [vmem:[#allocation5] sm:$0xff] %v21_v0  ;;  %s30_s19 = int_to_ptr.vmem [resolvable:$true] %s29_s19 }
  0x14   :  { %s62_s20 = scalar_lea.vmem %s30_s19, 128  ;;  %p67_p9 = scmp.lt.s32.totalorder %s30_s19, %s30_s19 }
  0x15   :  { %p63_p8 = scmp.ne.s32.totalorder %s30_s19, %s62_s20  ;;  %p68_p10 = scmp.lt.s32.totalorder %s62_s20, %s62_s20 }
  0x17   :  { %p69_p11 = por %p68_p10, %p67_p9 }
  0x19   :  { %p70_p12 = pnand %p69_p11, %p63_p8 }
  0x1b   :  { %73 = shalt.err (!%p70_p12)
}
  0x1c   :  { %s74_s23 = scalar_lea.hbm %s125_s1, 128 }
  0x1d   :  { %p75_p13 = scmp.ne.s32.totalorder %s125_s1, %s74_s23  ;;  %p78_p0 = scmp.lt.u32.totalorder %s74_s23, %s125_s1 }
  0x1f   :  { %p80_p1 = pnand %p78_p0, %p75_p13 }
  0x21   :  { %83 = shalt.err (!%p80_p1)
}
  0x22   :  { %32 = dma.vmem_to_hbm [thread:$0]  %s30_s19, 128, %s125_s1, [#allocation4]  }
  0x23   :  { %86 = dma.done.wait [#allocation4], 128  }
  0x24   :  { %87 = vsyncadd [#allocation4], 4294967168 }
  0x25   :  { %36 = vsyncpa [#allocation3], 1 }
  0x26   :  { %37 = vsyncpa [#allocation4], 1 }

</bundles_post_ra>
